<compile_context>
chip_gen: v5e
topology: v5e:2x2
jax: 0.10.0
libtpu: 0.0.40
codegen_flags: <defaults>
</compile_context>

<pallas_src>
import math

import jax
import jax.numpy as jnp
from jax.experimental import pallas as pl
from jax.experimental.pallas import tpu as pltpu

ALPHA = 0.9  # ResetSpikeFunction default alpha


def _round_up(x, m):
    return ((x + m - 1) // m) * m


def _make_kernel(block_t, block_b, block_n, din, alpha):
    def kernel(x_ref, w_ref, b_ref, g_ref, o_ref, y_ref, u_ref, r_ref):
        # grid = (neuron_tiles, batch_tiles, time_chunks); time is last (sequential).
        first_chunk = pl.program_id(2) == 0

        # Re-initialize recurrence state when a new (neuron, batch) tile starts.
        @pl.when(first_chunk)
        def _():
            u_ref[...] = jnp.zeros_like(u_ref)
            r_ref[...] = jnp.zeros_like(r_ref)

        # One MXU call for the whole time chunk:
        #   (block_t*block_b, Din) @ (Din, block_n) -> f32.
        # (1 - alpha) is already folded into w and b by the wrapper.
        x_flat = x_ref[...].reshape(block_t * block_b, din)
        y = jnp.dot(x_flat, w_ref[...], preferred_element_type=jnp.float32) + b_ref[...]
        y_ref[...] = y.reshape(block_t, block_b, block_n)

        # Hoisted broadcast (JAX does not CSE broadcast_in_dim across the unrolled loop).
        g_b = jnp.broadcast_to(g_ref[...], (block_b, block_n))

        u = u_ref[...]
        r = r_ref[...]
        for t in range(block_t):                       # static, fully unrolled
            u_cand = alpha * u + y_ref[t] - r          # contiguous (block_b, block_n) load
            m = u_cand > 0                             # spike mask (strict > 0)
            r = jnp.where(m, g_b, 0.0)                 # reset = z_t * gamma for next step
            o_ref[t] = m.astype(o_ref.dtype)           # contiguous full-slab store
            if t == 0:
                # Global t == 0 (first chunk only): z0 = heaviside(y0), membrane stays 0,
                # exactly as in ResetSpikeFunction (u only starts integrating at t = 1).
                u = jnp.where(first_chunk, jnp.zeros_like(u_cand), u_cand)
            else:
                u = u_cand

        u_ref[...] = u
        r_ref[...] = r

    return kernel


def _vmem_limit_bytes(block_t, block_b, block_n, din, out_bytes):
    x_blk = 2 * block_t * block_b * din * 2                 # bf16, double-buffered
    w_blk = 2 * din * block_n * 2                           # bf16 weight tile
    bg_blk = 2 * 2 * block_n * 4                            # bias + gamma
    out_blk = 2 * block_t * block_b * block_n * out_bytes   # double-buffered output
    scratch = block_t * block_b * block_n * 4 + 2 * block_b * block_n * 4
    total = x_blk + w_blk + bg_blk + out_blk + scratch
    # Headroom for compiler-internal scratch; cap below the 64 MiB per-TC VMEM of v7x.
    return int(min(48 * 2**20, max(int(total * 1.5) + (2 << 20), 16 * 2**20)))


def naive_spike_layer(x, w, b, gamma, *, alpha=ALPHA,
                      compute_dtype=jnp.bfloat16, out_dtype=jnp.float32,
                      block_b=None, block_n=None, block_t=16):
    """x: (B, T, Din); w: (Din, N) (transposed from torch's (N, Din)); b: (N,);
    gamma: (N,). Returns (B, T, N) of 0/1 spikes in out_dtype.

    Note: spikes are exactly 0/1, so out_dtype=bfloat16 is lossless and halves
    output HBM writeback (recommended on v5e)."""
    B, T, Din = x.shape
    N = w.shape[1]

    # ---- fold (1 - alpha) into the linear layer (identical recurrence, fewer VPU muls)
    scale = 1.0 - float(alpha)
    w_s = w * scale
    b_s = b.astype(jnp.float32) * scale

    # ---- tile sizes --------------------------------------------------------
    sub = 16 if compute_dtype == jnp.bfloat16 else 8   # packed sublane tile of x
    if block_b is None:
        block_b = 128 if B >= 128 else _round_up(B, sub)
    block_b = max(sub, _round_up(block_b, sub))

    N128 = _round_up(N, 128)
    if block_n is None:
        # Collapse the neuron axis when the resident weight tile is small enough:
        # x then streams from HBM exactly once.
        if Din * N128 * 2 <= (8 << 20):
            block_n = N128
        else:
            block_n = 256 if N128 >= 256 else 128
    block_n = _round_up(block_n, 128)

    block_t = max(1, min(int(block_t), T))

    # v7x megacore: keep >= 2 parallel (neuron x batch) tiles when possible so
    # both TensorCores per chip get work.
    n_par = (_round_up(N, block_n) // block_n) * (_round_up(B, block_b) // block_b)
    if n_par < 2 and block_b > sub:
        block_b = max(sub, _round_up(block_b // 2, sub))

    B_p = _round_up(B, block_b)
    T_p = _round_up(T, block_t)
    N_p = _round_up(N, block_n)

    # ---- pad + cast; time-major x so in-kernel accesses are contiguous ------
    x_tm = jnp.transpose(x, (1, 0, 2))                                  # (T, B, Din)
    x_tm = jnp.pad(x_tm, ((0, T_p - T), (0, B_p - B), (0, 0))).astype(compute_dtype)
    w_p = jnp.pad(w_s, ((0, 0), (0, N_p - N))).astype(compute_dtype)
    b_p = jnp.pad(b_s, (0, N_p - N)).reshape(1, N_p)
    g_p = jnp.pad(gamma.astype(jnp.float32), (0, N_p - N)).reshape(1, N_p)

    grid = (N_p // block_n, B_p // block_b, T_p // block_t)
    kernel = _make_kernel(block_t, block_b, block_n, Din, float(alpha))
    out_bytes = jnp.dtype(out_dtype).itemsize

    out_tm = pl.pallas_call(
        kernel,
        out_shape=jax.ShapeDtypeStruct((T_p, B_p, N_p), out_dtype),
        grid_spec=pltpu.PrefetchScalarGridSpec(
            num_scalar_prefetch=0,
            grid=grid,
            in_specs=[
                # x chunk (time-major): one big contiguous DMA per grid step.
                pl.BlockSpec((block_t, block_b, Din), lambda ni, bi, ti: (ti, bi, 0)),
                # weight tile: depends only on ni (outermost) -> streamed from HBM once,
                # resident across the whole batch/time sweep.
                pl.BlockSpec((Din, block_n), lambda ni, bi, ti: (0, ni)),
                pl.BlockSpec((1, block_n), lambda ni, bi, ti: (0, ni)),   # (1-alpha)*bias
                pl.BlockSpec((1, block_n), lambda ni, bi, ti: (0, ni)),   # reset_gamma
            ],
            # time-major output: each z_t store is a full (block_b, block_n) slab.
            out_specs=pl.BlockSpec((block_t, block_b, block_n),
                                   lambda ni, bi, ti: (ti, bi, ni)),
            scratch_shapes=[
                pltpu.VMEM((block_t, block_b, block_n), jnp.float32),  # y' chunk
                pltpu.VMEM((block_b, block_n), jnp.float32),           # membrane u
                pltpu.VMEM((block_b, block_n), jnp.float32),           # reset = z_{t-1}*gamma
            ],
        ),
        compiler_params=pltpu.CompilerParams(
            # time MUST stay the last (innermost, sequential) axis so the pl.when
            # state re-initialization fires once per (neuron, batch) tile.
            dimension_semantics=("parallel", "parallel", "arbitrary"),
            vmem_limit_bytes=_vmem_limit_bytes(block_t, block_b, block_n, Din, out_bytes),
        ),
    )(x_tm, w_p, b_p, g_p)

    # Slice off padding and transpose back to (B, T, N). Padded rows/steps/lanes
    # never feed real outputs (state is per (batch, neuron) element).
    return jnp.transpose(out_tm[:T, :B, :N], (1, 0, 2))


def reference(x, w, b, gamma, alpha=ALPHA, compute_dtype=jnp.bfloat16):
    """Pure-JAX reference mirroring the PyTorch forward with the same numerics as
    the kernel (bf16 matmul inputs, (1-alpha) folded into the linear layer)."""
    scale = 1.0 - float(alpha)
    y = jnp.dot(x.astype(compute_dtype), (w * scale).astype(compute_dtype),
                preferred_element_type=jnp.float32) + (b.astype(jnp.float32) * scale)
    B, T, N = y.shape
    z = (y[:, 0, :] > 0).astype(jnp.float32)
    u = jnp.zeros((B, N), jnp.float32)
    zs = [z]
    for t in range(1, T):
        u = alpha * u + y[:, t, :] - zs[-1] * gamma
        zs.append((u > 0).astype(jnp.float32))
    return jnp.stack(zs, axis=1)


if __name__ == "__main__":
    B, T, Din, N = 4, 8, 16, 32

    key = jax.random.PRNGKey(0)
    kx, kw, kb = jax.random.split(key, 3)

    # Deterministic params mimicking nn.Linear's uniform(-1/sqrt(fan_in), 1/sqrt(fan_in)).
    bound = 1.0 / math.sqrt(Din)
    w_torch = jax.random.uniform(kw, (N, Din), jnp.float32, -bound, bound)  # torch layout
    b_lin = jax.random.uniform(kb, (N,), jnp.float32, -bound, bound)
    w = w_torch.T                               # (Din, N) for the kernel
    gamma = jnp.ones((N,), jnp.float32)         # reset_gamma init (ones, per module __init__)

    x = jax.random.normal(kx, (B, T, Din), jnp.float32)

    out = naive_spike_layer(x, w, b_lin, gamma)
    out = jax.block_until_ready(out)

    ref = reference(x, w, b_lin, gamma)
    assert out.shape == (B, T, N)
    assert jnp.allclose(out, ref), "mismatch vs pure-JAX reference"

    print("KERNEL_OK")
</pallas_src>

<mosaic_0001>
module attributes {stable_mosaic.version = 11 : i64} {
  func.func @kernel(%arg0: i32, %arg1: i32, %arg2: i32, %arg3: memref<8x16x16xbf16, #tpu.memory_space<vmem>>, %arg4: memref<16x128xbf16, #tpu.memory_space<vmem>>, %arg5: memref<1x128xf32, #tpu.memory_space<vmem>>, %arg6: memref<1x128xf32, #tpu.memory_space<vmem>>, %arg7: memref<8x16x128xf32, #tpu.memory_space<vmem>>, %arg8: memref<8x16x128xf32, #tpu.memory_space<vmem>>, %arg9: memref<16x128xf32, #tpu.memory_space<vmem>>, %arg10: memref<16x128xf32, #tpu.memory_space<vmem>>) attributes {dimension_semantics = [#tpu.dimension_semantics<parallel>, #tpu.dimension_semantics<parallel>, #tpu.dimension_semantics<arbitrary>], iteration_bounds = array<i64: 1, 1, 1>, scalar_prefetch = 0 : i64, scratch_operands = 3 : i64, tpu.core_type = #tpu.core_type<tc>, window_params = [{transform_indices = @transform_0, window_bounds = array<i64: 8, 16, 16>}, {transform_indices = @transform_1, window_bounds = array<i64: 16, 128>}, {transform_indices = @transform_2, window_bounds = array<i64: 1, 128>}, {transform_indices = @transform_3, window_bounds = array<i64: 1, 128>}, {transform_indices = @transform_4, window_bounds = array<i64: 8, 16, 128>}]} {
    %c0_i32 = arith.constant 0 : i32
    %0 = arith.cmpi eq, %arg2, %c0_i32 : i32
    %1 = arith.extui %0 : i1 to i32
    %c0_i32_0 = arith.constant 0 : i32
    %2 = arith.cmpi ne, %1, %c0_i32_0 : i32
    scf.if %2 {
      %cst_86 = arith.constant 0.000000e+00 : f32
      %141 = vector.broadcast %cst_86 : f32 to vector<16x128xf32>
      %c0_87 = arith.constant 0 : index
      %c0_88 = arith.constant 0 : index
      %142 = vector.load %arg9[%c0_87, %c0_88] : memref<16x128xf32, #tpu.memory_space<vmem>>, vector<16x128xf32>
      tpu.vector_store %arg9[%c0_87, %c0_88], %141 {strides = array<i32>} : memref<16x128xf32, #tpu.memory_space<vmem>>, vector<16x128xf32>,
      %cst_89 = arith.constant 0.000000e+00 : f32
      %143 = vector.broadcast %cst_89 : f32 to vector<16x128xf32>
      %c0_90 = arith.constant 0 : index
      %c0_91 = arith.constant 0 : index
      %144 = vector.load %arg10[%c0_90, %c0_91] : memref<16x128xf32, #tpu.memory_space<vmem>>, vector<16x128xf32>
      tpu.vector_store %arg10[%c0_90, %c0_91], %143 {strides = array<i32>} : memref<16x128xf32, #tpu.memory_space<vmem>>, vector<16x128xf32>,
    } else {
    }
    %c0 = arith.constant 0 : index
    %c0_1 = arith.constant 0 : index
    %c0_2 = arith.constant 0 : index
    %3 = vector.load %arg3[%c0, %c0_1, %c0_2] : memref<8x16x16xbf16, #tpu.memory_space<vmem>>, vector<8x16x16xbf16>
    %4 = vector.shape_cast %3 : vector<8x16x16xbf16> to vector<128x16xbf16>
    %c0_3 = arith.constant 0 : index
    %c0_4 = arith.constant 0 : index
    %5 = vector.load %arg4[%c0_3, %c0_4] : memref<16x128xbf16, #tpu.memory_space<vmem>>, vector<16x128xbf16>
    %cst = arith.constant dense<0.000000e+00> : vector<128x128xf32>
    %6 = tpu.matmul %4, %5, %cst {dimension_numbers = #tpu.dot_dimension_numbers<[1], [0], [0], [1], [0, 0, 1, 1], [], []>} : vector<128x16xbf16>, vector<16x128xbf16>, vector<128x128xf32> -> vector<128x128xf32>
    %c0_5 = arith.constant 0 : index
    %c0_6 = arith.constant 0 : index
    %7 = vector.load %arg5[%c0_5, %c0_6] : memref<1x128xf32, #tpu.memory_space<vmem>>, vector<1x128xf32>
    %8 = vector.broadcast %7 : vector<1x128xf32> to vector<128x128xf32>
    %9 = arith.addf %6, %8 : vector<128x128xf32>
    %10 = vector.shape_cast %9 : vector<128x128xf32> to vector<8x16x128xf32>
    %c0_7 = arith.constant 0 : index
    %c0_8 = arith.constant 0 : index
    %c0_9 = arith.constant 0 : index
    %11 = vector.load %arg8[%c0_7, %c0_8, %c0_9] : memref<8x16x128xf32, #tpu.memory_space<vmem>>, vector<8x16x128xf32>
    tpu.vector_store %arg8[%c0_7, %c0_8, %c0_9], %10 {strides = array<i32>} : memref<8x16x128xf32, #tpu.memory_space<vmem>>, vector<8x16x128xf32>,
    %c0_10 = arith.constant 0 : index
    %c0_11 = arith.constant 0 : index
    %12 = vector.load %arg6[%c0_10, %c0_11] : memref<1x128xf32, #tpu.memory_space<vmem>>, vector<1x128xf32>
    %13 = vector.shape_cast %12 : vector<1x128xf32> to vector<1x128xf32>
    %14 = vector.broadcast %13 : vector<1x128xf32> to vector<16x128xf32>
    %c0_12 = arith.constant 0 : index
    %c0_13 = arith.constant 0 : index
    %15 = vector.load %arg9[%c0_12, %c0_13] : memref<16x128xf32, #tpu.memory_space<vmem>>, vector<16x128xf32>
    %c0_14 = arith.constant 0 : index
    %c0_15 = arith.constant 0 : index
    %16 = vector.load %arg10[%c0_14, %c0_15] : memref<16x128xf32, #tpu.memory_space<vmem>>, vector<16x128xf32>
    %cst_16 = arith.constant 0.899999976 : f32
    %17 = vector.broadcast %cst_16 : f32 to vector<16x128xf32>
    %18 = arith.mulf %17, %15 : vector<16x128xf32>
    %c0_17 = arith.constant 0 : index
    %c0_18 = arith.constant 0 : index
    %c0_19 = arith.constant 0 : index
    %19 = vector.load %arg8[%c0_17, %c0_18, %c0_19] : memref<8x16x128xf32, #tpu.memory_space<vmem>>, vector<1x16x128xf32>
    %20 = vector.shape_cast %19 : vector<1x16x128xf32> to vector<16x128xf32>
    %21 = arith.addf %18, %20 : vector<16x128xf32>
    %22 = arith.subf %21, %16 : vector<16x128xf32>
    %cst_20 = arith.constant 0.000000e+00 : f32
    %23 = vector.broadcast %cst_20 : f32 to vector<16x128xf32>
    %24 = arith.cmpf ogt, %22, %23 : vector<16x128xf32>
    %cst_21 = arith.constant 0.000000e+00 : f32
    %25 = vector.broadcast %cst_21 : f32 to vector<16x128xf32>
    %26 = arith.select %24, %14, %25 : vector<16x128xi1>, vector<16x128xf32>
    %27 = arith.extui %24 : vector<16x128xi1> to vector<16x128xi32>
    %28 = arith.sitofp %27 : vector<16x128xi32> to vector<16x128xf32>
    %c0_22 = arith.constant 0 : index
    %c0_23 = arith.constant 0 : index
    %c0_24 = arith.constant 0 : index
    %29 = vector.load %arg7[%c0_22, %c0_23, %c0_24] : memref<8x16x128xf32, #tpu.memory_space<vmem>>, vector<1x16x128xf32>
    %30 = vector.shape_cast %29 : vector<1x16x128xf32> to vector<16x128xf32>
    %31 = vector.shape_cast %28 : vector<16x128xf32> to vector<1x16x128xf32>
    tpu.vector_store %arg7[%c0_22, %c0_23, %c0_24], %31 {strides = array<i32>} : memref<8x16x128xf32, #tpu.memory_space<vmem>>, vector<1x16x128xf32>,
    %cst_25 = arith.constant 0.000000e+00 : f32
    %32 = vector.broadcast %cst_25 : f32 to vector<16x128xf32>
    %33 = arith.select %0, %32, %22 : vector<16x128xf32>
    %cst_26 = arith.constant 0.899999976 : f32
    %34 = vector.broadcast %cst_26 : f32 to vector<16x128xf32>
    %35 = arith.mulf %34, %33 : vector<16x128xf32>
    %c1 = arith.constant 1 : index
    %c0_27 = arith.constant 0 : index
    %c0_28 = arith.constant 0 : index
    %36 = vector.load %arg8[%c1, %c0_27, %c0_28] : memref<8x16x128xf32, #tpu.memory_space<vmem>>, vector<1x16x128xf32>
    %37 = vector.shape_cast %36 : vector<1x16x128xf32> to vector<16x128xf32>
    %38 = arith.addf %35, %37 : vector<16x128xf32>
    %39 = arith.subf %38, %26 : vector<16x128xf32>
    %cst_29 = arith.constant 0.000000e+00 : f32
    %40 = vector.broadcast %cst_29 : f32 to vector<16x128xf32>
    %41 = arith.cmpf ogt, %39, %40 : vector<16x128xf32>
    %cst_30 = arith.constant 0.000000e+00 : f32
    %42 = vector.broadcast %cst_30 : f32 to vector<16x128xf32>
    %43 = arith.select %41, %14, %42 : vector<16x128xi1>, vector<16x128xf32>
    %44 = arith.extui %41 : vector<16x128xi1> to vector<16x128xi32>
    %45 = arith.sitofp %44 : vector<16x128xi32> to vector<16x128xf32>
    %c1_31 = arith.constant 1 : index
    %c0_32 = arith.constant 0 : index
    %c0_33 = arith.constant 0 : index
    %46 = vector.load %arg7[%c1_31, %c0_32, %c0_33] : memref<8x16x128xf32, #tpu.memory_space<vmem>>, vector<1x16x128xf32>
    %47 = vector.shape_cast %46 : vector<1x16x128xf32> to vector<16x128xf32>
    %48 = vector.shape_cast %45 : vector<16x128xf32> to vector<1x16x128xf32>
    tpu.vector_store %arg7[%c1_31, %c0_32, %c0_33], %48 {strides = array<i32>} : memref<8x16x128xf32, #tpu.memory_space<vmem>>, vector<1x16x128xf32>,
    %cst_34 = arith.constant 0.899999976 : f32
    %49 = vector.broadcast %cst_34 : f32 to vector<16x128xf32>
    %50 = arith.mulf %49, %39 : vector<16x128xf32>
    %c2 = arith.constant 2 : index
    %c0_35 = arith.constant 0 : index
    %c0_36 = arith.constant 0 : index
    %51 = vector.load %arg8[%c2, %c0_35, %c0_36] : memref<8x16x128xf32, #tpu.memory_space<vmem>>, vector<1x16x128xf32>
    %52 = vector.shape_cast %51 : vector<1x16x128xf32> to vector<16x128xf32>
    %53 = arith.addf %50, %52 : vector<16x128xf32>
    %54 = arith.subf %53, %43 : vector<16x128xf32>
    %cst_37 = arith.constant 0.000000e+00 : f32
    %55 = vector.broadcast %cst_37 : f32 to vector<16x128xf32>
    %56 = arith.cmpf ogt, %54, %55 : vector<16x128xf32>
    %cst_38 = arith.constant 0.000000e+00 : f32
    %57 = vector.broadcast %cst_38 : f32 to vector<16x128xf32>
    %58 = arith.select %56, %14, %57 : vector<16x128xi1>, vector<16x128xf32>
    %59 = arith.extui %56 : vector<16x128xi1> to vector<16x128xi32>
    %60 = arith.sitofp %59 : vector<16x128xi32> to vector<16x128xf32>
    %c2_39 = arith.constant 2 : index
    %c0_40 = arith.constant 0 : index
    %c0_41 = arith.constant 0 : index
    %61 = vector.load %arg7[%c2_39, %c0_40, %c0_41] : memref<8x16x128xf32, #tpu.memory_space<vmem>>, vector<1x16x128xf32>
    %62 = vector.shape_cast %61 : vector<1x16x128xf32> to vector<16x128xf32>
    %63 = vector.shape_cast %60 : vector<16x128xf32> to vector<1x16x128xf32>
    tpu.vector_store %arg7[%c2_39, %c0_40, %c0_41], %63 {strides = array<i32>} : memref<8x16x128xf32, #tpu.memory_space<vmem>>, vector<1x16x128xf32>,
    %cst_42 = arith.constant 0.899999976 : f32
    %64 = vector.broadcast %cst_42 : f32 to vector<16x128xf32>
    %65 = arith.mulf %64, %54 : vector<16x128xf32>
    %c3 = arith.constant 3 : index
    %c0_43 = arith.constant 0 : index
    %c0_44 = arith.constant 0 : index
    %66 = vector.load %arg8[%c3, %c0_43, %c0_44] : memref<8x16x128xf32, #tpu.memory_space<vmem>>, vector<1x16x128xf32>
    %67 = vector.shape_cast %66 : vector<1x16x128xf32> to vector<16x128xf32>
    %68 = arith.addf %65, %67 : vector<16x128xf32>
    %69 = arith.subf %68, %58 : vector<16x128xf32>
    %cst_45 = arith.constant 0.000000e+00 : f32
    %70 = vector.broadcast %cst_45 : f32 to vector<16x128xf32>
    %71 = arith.cmpf ogt, %69, %70 : vector<16x128xf32>
    %cst_46 = arith.constant 0.000000e+00 : f32
    %72 = vector.broadcast %cst_46 : f32 to vector<16x128xf32>
    %73 = arith.select %71, %14, %72 : vector<16x128xi1>, vector<16x128xf32>
    %74 = arith.extui %71 : vector<16x128xi1> to vector<16x128xi32>
    %75 = arith.sitofp %74 : vector<16x128xi32> to vector<16x128xf32>
    %c3_47 = arith.constant 3 : index
    %c0_48 = arith.constant 0 : index
    %c0_49 = arith.constant 0 : index
    %76 = vector.load %arg7[%c3_47, %c0_48, %c0_49] : memref<8x16x128xf32, #tpu.memory_space<vmem>>, vector<1x16x128xf32>
    %77 = vector.shape_cast %76 : vector<1x16x128xf32> to vector<16x128xf32>
    %78 = vector.shape_cast %75 : vector<16x128xf32> to vector<1x16x128xf32>
    tpu.vector_store %arg7[%c3_47, %c0_48, %c0_49], %78 {strides = array<i32>} : memref<8x16x128xf32, #tpu.memory_space<vmem>>, vector<1x16x128xf32>,
    %cst_50 = arith.constant 0.899999976 : f32
    %79 = vector.broadcast %cst_50 : f32 to vector<16x128xf32>
    %80 = arith.mulf %79, %69 : vector<16x128xf32>
    %c4 = arith.constant 4 : index
    %c0_51 = arith.constant 0 : index
    %c0_52 = arith.constant 0 : index
    %81 = vector.load %arg8[%c4, %c0_51, %c0_52] : memref<8x16x128xf32, #tpu.memory_space<vmem>>, vector<1x16x128xf32>
    %82 = vector.shape_cast %81 : vector<1x16x128xf32> to vector<16x128xf32>
    %83 = arith.addf %80, %82 : vector<16x128xf32>
    %84 = arith.subf %83, %73 : vector<16x128xf32>
    %cst_53 = arith.constant 0.000000e+00 : f32
    %85 = vector.broadcast %cst_53 : f32 to vector<16x128xf32>
    %86 = arith.cmpf ogt, %84, %85 : vector<16x128xf32>
    %cst_54 = arith.constant 0.000000e+00 : f32
    %87 = vector.broadcast %cst_54 : f32 to vector<16x128xf32>
    %88 = arith.select %86, %14, %87 : vector<16x128xi1>, vector<16x128xf32>
    %89 = arith.extui %86 : vector<16x128xi1> to vector<16x128xi32>
    %90 = arith.sitofp %89 : vector<16x128xi32> to vector<16x128xf32>
    %c4_55 = arith.constant 4 : index
    %c0_56 = arith.constant 0 : index
    %c0_57 = arith.constant 0 : index
    %91 = vector.load %arg7[%c4_55, %c0_56, %c0_57] : memref<8x16x128xf32, #tpu.memory_space<vmem>>, vector<1x16x128xf32>
    %92 = vector.shape_cast %91 : vector<1x16x128xf32> to vector<16x128xf32>
    %93 = vector.shape_cast %90 : vector<16x128xf32> to vector<1x16x128xf32>
    tpu.vector_store %arg7[%c4_55, %c0_56, %c0_57], %93 {strides = array<i32>} : memref<8x16x128xf32, #tpu.memory_space<vmem>>, vector<1x16x128xf32>,
    %cst_58 = arith.constant 0.899999976 : f32
    %94 = vector.broadcast %cst_58 : f32 to vector<16x128xf32>
    %95 = arith.mulf %94, %84 : vector<16x128xf32>
    %c5 = arith.constant 5 : index
    %c0_59 = arith.constant 0 : index
    %c0_60 = arith.constant 0 : index
    %96 = vector.load %arg8[%c5, %c0_59, %c0_60] : memref<8x16x128xf32, #tpu.memory_space<vmem>>, vector<1x16x128xf32>
    %97 = vector.shape_cast %96 : vector<1x16x128xf32> to vector<16x128xf32>
    %98 = arith.addf %95, %97 : vector<16x128xf32>
    %99 = arith.subf %98, %88 : vector<16x128xf32>
    %cst_61 = arith.constant 0.000000e+00 : f32
    %100 = vector.broadcast %cst_61 : f32 to vector<16x128xf32>
    %101 = arith.cmpf ogt, %99, %100 : vector<16x128xf32>
    %cst_62 = arith.constant 0.000000e+00 : f32
    %102 = vector.broadcast %cst_62 : f32 to vector<16x128xf32>
    %103 = arith.select %101, %14, %102 : vector<16x128xi1>, vector<16x128xf32>
    %104 = arith.extui %101 : vector<16x128xi1> to vector<16x128xi32>
    %105 = arith.sitofp %104 : vector<16x128xi32> to vector<16x128xf32>
    %c5_63 = arith.constant 5 : index
    %c0_64 = arith.constant 0 : index
    %c0_65 = arith.constant 0 : index
    %106 = vector.load %arg7[%c5_63, %c0_64, %c0_65] : memref<8x16x128xf32, #tpu.memory_space<vmem>>, vector<1x16x128xf32>
    %107 = vector.shape_cast %106 : vector<1x16x128xf32> to vector<16x128xf32>
    %108 = vector.shape_cast %105 : vector<16x128xf32> to vector<1x16x128xf32>
    tpu.vector_store %arg7[%c5_63, %c0_64, %c0_65], %108 {strides = array<i32>} : memref<8x16x128xf32, #tpu.memory_space<vmem>>, vector<1x16x128xf32>,
    %cst_66 = arith.constant 0.899999976 : f32
    %109 = vector.broadcast %cst_66 : f32 to vector<16x128xf32>
    %110 = arith.mulf %109, %99 : vector<16x128xf32>
    %c6 = arith.constant 6 : index
    %c0_67 = arith.constant 0 : index
    %c0_68 = arith.constant 0 : index
    %111 = vector.load %arg8[%c6, %c0_67, %c0_68] : memref<8x16x128xf32, #tpu.memory_space<vmem>>, vector<1x16x128xf32>
    %112 = vector.shape_cast %111 : vector<1x16x128xf32> to vector<16x128xf32>
    %113 = arith.addf %110, %112 : vector<16x128xf32>
    %114 = arith.subf %113, %103 : vector<16x128xf32>
    %cst_69 = arith.constant 0.000000e+00 : f32
    %115 = vector.broadcast %cst_69 : f32 to vector<16x128xf32>
    %116 = arith.cmpf ogt, %114, %115 : vector<16x128xf32>
    %cst_70 = arith.constant 0.000000e+00 : f32
    %117 = vector.broadcast %cst_70 : f32 to vector<16x128xf32>
    %118 = arith.select %116, %14, %117 : vector<16x128xi1>, vector<16x128xf32>
    %119 = arith.extui %116 : vector<16x128xi1> to vector<16x128xi32>
    %120 = arith.sitofp %119 : vector<16x128xi32> to vector<16x128xf32>
    %c6_71 = arith.constant 6 : index
    %c0_72 = arith.constant 0 : index
    %c0_73 = arith.constant 0 : index
    %121 = vector.load %arg7[%c6_71, %c0_72, %c0_73] : memref<8x16x128xf32, #tpu.memory_space<vmem>>, vector<1x16x128xf32>
    %122 = vector.shape_cast %121 : vector<1x16x128xf32> to vector<16x128xf32>
    %123 = vector.shape_cast %120 : vector<16x128xf32> to vector<1x16x128xf32>
    tpu.vector_store %arg7[%c6_71, %c0_72, %c0_73], %123 {strides = array<i32>} : memref<8x16x128xf32, #tpu.memory_space<vmem>>, vector<1x16x128xf32>,
    %cst_74 = arith.constant 0.899999976 : f32
    %124 = vector.broadcast %cst_74 : f32 to vector<16x128xf32>
    %125 = arith.mulf %124, %114 : vector<16x128xf32>
    %c7 = arith.constant 7 : index
    %c0_75 = arith.constant 0 : index
    %c0_76 = arith.constant 0 : index
    %126 = vector.load %arg8[%c7, %c0_75, %c0_76] : memref<8x16x128xf32, #tpu.memory_space<vmem>>, vector<1x16x128xf32>
    %127 = vector.shape_cast %126 : vector<1x16x128xf32> to vector<16x128xf32>
    %128 = arith.addf %125, %127 : vector<16x128xf32>
    %129 = arith.subf %128, %118 : vector<16x128xf32>
    %cst_77 = arith.constant 0.000000e+00 : f32
    %130 = vector.broadcast %cst_77 : f32 to vector<16x128xf32>
    %131 = arith.cmpf ogt, %129, %130 : vector<16x128xf32>
    %cst_78 = arith.constant 0.000000e+00 : f32
    %132 = vector.broadcast %cst_78 : f32 to vector<16x128xf32>
    %133 = arith.select %131, %14, %132 : vector<16x128xi1>, vector<16x128xf32>
    %134 = arith.extui %131 : vector<16x128xi1> to vector<16x128xi32>
    %135 = arith.sitofp %134 : vector<16x128xi32> to vector<16x128xf32>
    %c7_79 = arith.constant 7 : index
    %c0_80 = arith.constant 0 : index
    %c0_81 = arith.constant 0 : index
    %136 = vector.load %arg7[%c7_79, %c0_80, %c0_81] : memref<8x16x128xf32, #tpu.memory_space<vmem>>, vector<1x16x128xf32>
    %137 = vector.shape_cast %136 : vector<1x16x128xf32> to vector<16x128xf32>
    %138 = vector.shape_cast %135 : vector<16x128xf32> to vector<1x16x128xf32>
    tpu.vector_store %arg7[%c7_79, %c0_80, %c0_81], %138 {strides = array<i32>} : memref<8x16x128xf32, #tpu.memory_space<vmem>>, vector<1x16x128xf32>,
    %c0_82 = arith.constant 0 : index
    %c0_83 = arith.constant 0 : index
    %139 = vector.load %arg9[%c0_82, %c0_83] : memref<16x128xf32, #tpu.memory_space<vmem>>, vector<16x128xf32>
    tpu.vector_store %arg9[%c0_82, %c0_83], %129 {strides = array<i32>} : memref<16x128xf32, #tpu.memory_space<vmem>>, vector<16x128xf32>,
    %c0_84 = arith.constant 0 : index
    %c0_85 = arith.constant 0 : index
    %140 = vector.load %arg10[%c0_84, %c0_85] : memref<16x128xf32, #tpu.memory_space<vmem>>, vector<16x128xf32>
    tpu.vector_store %arg10[%c0_84, %c0_85], %133 {strides = array<i32>} : memref<16x128xf32, #tpu.memory_space<vmem>>, vector<16x128xf32>,
    return
  }
  func.func @transform_0(%arg0: i32, %arg1: i32, %arg2: i32) -> (i32, i32, i32) {
    %c0_i32 = arith.constant 0 : i32
    %c0_i32_0 = arith.constant 0 : i32
    return %arg2, %arg1, %c0_i32 : i32, i32, i32
  }
  func.func @transform_1(%arg0: i32, %arg1: i32, %arg2: i32) -> (i32, i32) {
    %c0_i32 = arith.constant 0 : i32
    %c0_i32_0 = arith.constant 0 : i32
    return %c0_i32, %arg0 : i32, i32
  }
  func.func @transform_2(%arg0: i32, %arg1: i32, %arg2: i32) -> (i32, i32) {
    %c0_i32 = arith.constant 0 : i32
    %c0_i32_0 = arith.constant 0 : i32
    return %c0_i32, %arg0 : i32, i32
  }
  func.func @transform_3(%arg0: i32, %arg1: i32, %arg2: i32) -> (i32, i32) {
    %c0_i32 = arith.constant 0 : i32
    %c0_i32_0 = arith.constant 0 : i32
    return %c0_i32, %arg0 : i32, i32
  }
  func.func @transform_4(%arg0: i32, %arg1: i32, %arg2: i32) -> (i32, i32, i32) {
    %c0_i32 = arith.constant 0 : i32
    return %arg2, %arg1, %arg0 : i32, i32, i32
  }
}

</mosaic_0001>

<bundles_post_ra>
// kernel: tpu_custom_call.1
= control target key start
LH: loop header
LB: loop body
LE: loop exit
PB: predicated region body
PF: predicated region fallthrough
CT: control target
= control target key end

     0   :  { %9 = vsyncpa [#allocation6], 0  ;;  %s680_s0 = inlined_call_operand.hbm [shape: bf16[8,16,16], index: 0, kind: input, shape index: {}]   ;;  %s681_s1 = inlined_call_operand.hbm [shape: bf16[16,128], index: 1, kind: input, shape index: {}]   ;;  %s682_s2 = inlined_call_operand.vmem [shape: f32[1,128], index: 2, kind: input, shape index: {}]   ;;  %s683_s3 = inlined_call_operand.vmem [shape: f32[1,128], index: 3, kind: input, shape index: {}]   ;;  %s684_s4 = inlined_call_operand.hbm [shape: f32[8,16,128], index: 4, kind: output, shape index: {}]  }
   0x1   :  { %10 = vsyncpa [#allocation9], 0 }
   0x2   :  { %11 = vsyncpa [#allocation7], 0  ;;  %s16_s17 = sshll.u32 %s680_s0, 4  ;;  %s572_s18 = smov [#allocation5]   ;;  %s17_s17 = int_to_ptr.hbm [resolvable:$true] %s16_s17 }
   0x3   :  { %s18_s19 = sshll.u32 %s572_s18, 4  ;;  %s29_s22 = sshll.u32 %s681_s1, 4  ;;  %s19_s19 = int_to_ptr.vmem [resolvable:$true] %s18_s19  ;;  %s30_s22 = int_to_ptr.hbm [resolvable:$true] %s29_s22 }
   0x4   :  { %s573_s23 = smov 64   ;;  %s574_s24 = smov 4  }
   0x5   :  { %24 = dma.hbm_to_vmem [thread:$0]  %s17_s17, 1024, %s19_s19, [#allocation6], %s573_s23, %s573_s23, %s574_s24  }
   0x6   :  { %s575_s25 = smov [#allocation8]  }
   0x7   :  { %s31_s26 = sshll.u32 %s575_s25, 4  ;;  %s32_s26 = int_to_ptr.vmem [resolvable:$true] %s31_s26 }
   0x8   :  { %37 = dma.hbm_to_vmem [thread:$0]  %s30_s22, 128, %s32_s26, [#allocation9], %s573_s23, %s573_s23, %s574_s24  }
   0x9   :  { %566 = dma.done.wait [#allocation6], 1024  }
   0xa   :  { %567 = vsyncadd [#allocation6], 4294966272 }
   0xb   :  { %568 = dma.done.wait [#allocation9], 128  }
   0xc   :  { %569 = vsyncadd [#allocation9], 4294967168  ;;  %v480_v0 = vld [vmem:[#allocation8] sm:$0xff]  ;;  %v474_v2 = vld [vmem:[#allocation5 + $0x10] sm:$0xff]  ;;  %vm127_vm0 = vcmask 130048   ;;  %v576_v13 = vmov 0.0  }
   0xd   :  { %v472_v1 = vld [vmem:[#allocation5] sm:$0xff]  ;;  %159 = vmatpush.bf16.msra.mxu0 %v480_v0  ;;  %481 = vmatpush.bf16.msra.mxu1 %v480_v0  ;;  %v478_v4 = vld [vmem:[#allocation5 + $0x30] sm:$0xff]  ;;  %v473_v5 = vld [vmem:[#allocation5 + $0x8] sm:$0xff]  ;;  %s398_s5 = sshll.u32 %s684_s4, 4  ;;  %s578_s6 = smov 128   ;;  %s399_s5 = int_to_ptr.hbm [resolvable:$true] %s398_s5 }
   0xe   :  { %v476_v3 = vld [vmem:[#allocation5 + $0x20] sm:$0xff]  ;;  %482 = vmatpush.bf16.msra.mxu2 %v480_v0  ;;  %483 = vmatpush.bf16.msra.mxu3 %v480_v0  ;;  %v475_v6 = vld [vmem:[#allocation5 + $0x18] sm:$0xff]  ;;  %v477_v7 = vld [vmem:[#allocation5 + $0x28] sm:$0xff]  ;;  %s579_s7 = smov 8  }
   0xf   :  { %v479_v8 = vld [vmem:[#allocation5 + $0x38] sm:$0xff]  ;;  %v622_v9 = vld [vmem:[%s682_s2] ss:$0 sm:$0xff] }
  0x10   :  { %448 = vmatmul.msk.bf16.vlgmr.msra.gmra.mxu0 %vm127_vm0, %v472_v1  ;;  %450 = vmatmul.msk.bf16.vlgmr.msra.gmra.mxu1 %vm127_vm0, %v474_v2  ;;  %v632_v19 = vld [vmem:[%s683_s3] ss:$0 sm:$0xff]  ;;  %s577_s3 = smov [#allocation10]  }
  0x11   :  { %452 = vmatmul.msk.bf16.vlgmr.msra.gmra.mxu2 %vm127_vm0, %v476_v3  ;;  %454 = vmatmul.msk.bf16.vlgmr.msra.gmra.mxu3 %vm127_vm0, %v478_v4  ;;  %s396_s28 = sshll.u32 %s577_s3, 4  ;;  %s397_s28 = int_to_ptr.vmem [resolvable:$true] %s396_s28 }
  0x20   :  { %449 = vmatmul.msk.bf16.gmra.mxu0 %vm127_vm0, %v473_v5  ;;  %451 = vmatmul.msk.bf16.gmra.mxu1 %vm127_vm0, %v475_v6 }
  0x21   :  { %453 = vmatmul.msk.bf16.gmra.mxu2 %vm127_vm0, %v477_v7  ;;  %455 = vmatmul.msk.bf16.gmra.mxu3 %vm127_vm0, %v479_v8 }
  0x8d   :  { %v161_v10 = vpop.f32.mrf.mxu0  ;;  %v171_v12 = vpop.f32.mrf.mxu1 }
  0x8e   :  { %v162_v11 = vadd.f32 %v622_v9, %v161_v10  ;;  %v172_v25 = vadd.f32 %v622_v9, %v171_v12 }
  0x90   :  { %vm233_vm1 = vcmp.gt.f32.partialorder %v162_v11, 0.0 }
  0x91   :  { %v456_v14 = vsel %vm233_vm1, 1.0, %v576_v13  ;;  %v235_v23 = vsel %vm233_vm1, %v632_v19, 0.0 }
  0x92   :  { %241 = vst [vmem:[#allocation10] sm:$0xff] %v456_v14 }
  0x94   :  { %v181_v20 = vpop.f32.mrf.mxu2  ;;  %v191_v37 = vpop.f32.mrf.mxu3 }
  0x95   :  { %v163_v15 = vpop.f32.mrf.mxu0  ;;  %v173_v18 = vpop.f32.mrf.mxu1  ;;  %v182_v50 = vadd.f32 %v622_v9, %v181_v20 }
  0x96   :  { %v164_v16 = vadd.f32 %v622_v9, %v163_v15  ;;  %v174_v41 = vadd.f32 %v622_v9, %v173_v18  ;;  %v192_v15 = vadd.f32 %v622_v9, %v191_v37 }
  0x98   :  { %vm234_vm2 = vcmp.gt.f32.partialorder %v164_v16, 0.0 }
  0x99   :  { %v457_v17 = vsel %vm234_vm2, 1.0, %v576_v13  ;;  %v236_v36 = vsel %vm234_vm2, %v632_v19, 0.0 }
  0x9a   :  { %242 = vst [vmem:[#allocation10 + $0x8] sm:$0xff] %v457_v17 }
  0x9c   :  { %v183_v31 = vpop.f32.mrf.mxu2  ;;  %v193_v60 = vpop.f32.mrf.mxu3 }
  0x9d   :  { %v166_v21 = vpop.f32.mrf.mxu0  ;;  %v176_v28 = vpop.f32.mrf.mxu1  ;;  %v184_v4 = vadd.f32 %v622_v9, %v183_v31 }
  0x9e   :  { %v167_v22 = vadd.f32 %v622_v9, %v166_v21  ;;  %v177_v33 = vadd.f32 %v622_v9, %v176_v28 }
  0xa0   :  { %v255_v24 = vsub.f32 %v167_v22, %v235_v23 }
  0xa2   :  { %vm257_vm3 = vcmp.gt.f32.partialorder %v255_v24, 0.0  ;;  %v268_v26 = vmul.f32 0.9, %v255_v24 }
  0xa3   :  { %v458_v27 = vsel %vm257_vm3, 1.0, %v576_v13  ;;  %v259_v30 = vsel %vm257_vm3, %v632_v19, 0.0 }
  0xa4   :  { %266 = vst [vmem:[#allocation10 + $0x10] sm:$0xff] %v458_v27  ;;  %v273_v29 = vadd.f32 %v268_v26, %v172_v25  ;;  %v186_v54 = vpop.f32.mrf.mxu2  ;;  %v196_v20 = vpop.f32.mrf.mxu3 }
  0xa5   :  { %v168_v32 = vpop.f32.mrf.mxu0  ;;  %v178_v49 = vpop.f32.mrf.mxu1  ;;  %v187_v62 = vadd.f32 %v622_v9, %v186_v54  ;;  %v197_v27 = vadd.f32 %v622_v9, %v196_v20 }
  0xa6   :  { %v275_v34 = vsub.f32 %v273_v29, %v259_v30  ;;  %v169_v35 = vadd.f32 %v622_v9, %v168_v32  ;;  %v179_v55 = vadd.f32 %v622_v9, %v178_v49 }
  0xa8   :  { %vm277_vm4 = vcmp.gt.f32.partialorder %v275_v34, 0.0  ;;  %v288_v38 = vmul.f32 0.9, %v275_v34  ;;  %v256_v39 = vsub.f32 %v169_v35, %v236_v36 }
  0xa9   :  { %v460_v40 = vsel %vm277_vm4, 1.0, %v576_v13  ;;  %v279_v44 = vsel %vm277_vm4, %v632_v19, 0.0 }
  0xaa   :  { %286 = vst [vmem:[#allocation10 + $0x20] sm:$0xff] %v460_v40  ;;  %v293_v42 = vadd.f32 %v288_v38, %v177_v33  ;;  %vm258_vm5 = vcmp.gt.f32.partialorder %v256_v39, 0.0  ;;  %v269_v43 = vmul.f32 0.9, %v256_v39  ;;  %v194_v33 = vadd.f32 %v622_v9, %v193_v60 }
  0xab   :  { %v459_v45 = vsel %vm258_vm5, 1.0, %v576_v13  ;;  %v260_v48 = vsel %vm258_vm5, %v632_v19, 0.0 }
  0xac   :  { %v295_v46 = vsub.f32 %v293_v42, %v279_v44  ;;  %267 = vst [vmem:[#allocation10 + $0x18] sm:$0xff] %v459_v45  ;;  %v274_v47 = vadd.f32 %v269_v43, %v174_v41  ;;  %v188_v12 = vpop.f32.mrf.mxu2  ;;  %v198_v40 = vpop.f32.mrf.mxu3 }
  0xad   :  { %v189_v21 = vadd.f32 %v622_v9, %v188_v12  ;;  %v199_v44 = vadd.f32 %v622_v9, %v198_v40 }
  0xae   :  { %vm297_vm6 = vcmp.gt.f32.partialorder %v295_v46, 0.0  ;;  %v308_v51 = vmul.f32 0.9, %v295_v46  ;;  %v276_v52 = vsub.f32 %v274_v47, %v260_v48 }
  0xaf   :  { %v462_v53 = vsel %vm297_vm6, 1.0, %v576_v13  ;;  %v299_v59 = vsel %vm297_vm6, %v632_v19, 0.0 }
  0xb0   :  { %306 = vst [vmem:[#allocation10 + $0x30] sm:$0xff] %v462_v53  ;;  %vm278_vm7 = vcmp.gt.f32.partialorder %v276_v52, 0.0  ;;  %v289_v56 = vmul.f32 0.9, %v276_v52  ;;  %v313_v57 = vadd.f32 %v308_v51, %v182_v50 }
  0xb1   :  { %v461_v58 = vsel %vm278_vm7, 1.0, %v576_v13  ;;  %v280_v0 = vsel %vm278_vm7, %v632_v19, 0.0 }
  0xb2   :  { %287 = vst [vmem:[#allocation10 + $0x28] sm:$0xff] %v461_v58  ;;  %v294_v61 = vadd.f32 %v289_v56, %v179_v55  ;;  %v315_v63 = vsub.f32 %v313_v57, %v299_v59 }
  0xb4   :  { %v296_v1 = vsub.f32 %v294_v61, %v280_v0  ;;  %vm317_vm8 = vcmp.gt.f32.partialorder %v315_v63, 0.0  ;;  %v328_v2 = vmul.f32 0.9, %v315_v63 }
  0xb5   :  { %v464_v3 = vsel %vm317_vm8, 1.0, %v576_v13  ;;  %v319_v8 = vsel %vm317_vm8, %v632_v19, 0.0 }
  0xb6   :  { %vm298_vm9 = vcmp.gt.f32.partialorder %v296_v1, 0.0  ;;  %v309_v5 = vmul.f32 0.9, %v296_v1  ;;  %326 = vst [vmem:[#allocation10 + $0x40] sm:$0xff] %v464_v3  ;;  %v333_v6 = vadd.f32 %v328_v2, %v187_v62 }
  0xb7   :  { %v463_v7 = vsel %vm298_vm9, 1.0, %v576_v13  ;;  %v300_v14 = vsel %vm298_vm9, %v632_v19, 0.0 }
  0xb8   :  { %307 = vst [vmem:[#allocation10 + $0x38] sm:$0xff] %v463_v7  ;;  %v335_v10 = vsub.f32 %v333_v6, %v319_v8  ;;  %v314_v11 = vadd.f32 %v309_v5, %v184_v4 }
  0xba   :  { %vm337_vm10 = vcmp.gt.f32.partialorder %v335_v10, 0.0  ;;  %v348_v16 = vmul.f32 0.9, %v335_v10  ;;  %v316_v17 = vsub.f32 %v314_v11, %v300_v14 }
  0xbb   :  { %v466_v18 = vsel %vm337_vm10, 1.0, %v576_v13  ;;  %v339_v25 = vsel %vm337_vm10, %v632_v19, 0.0 }
  0xbc   :  { %346 = vst [vmem:[#allocation10 + $0x50] sm:$0xff] %v466_v18  ;;  %vm318_vm11 = vcmp.gt.f32.partialorder %v316_v17, 0.0  ;;  %v329_v22 = vmul.f32 0.9, %v316_v17  ;;  %v353_v23 = vadd.f32 %v348_v16, %v192_v15 }
  0xbd   :  { %v465_v24 = vsel %vm318_vm11, 1.0, %v576_v13  ;;  %v320_v29 = vsel %vm318_vm11, %v632_v19, 0.0 }
  0xbe   :  { %327 = vst [vmem:[#allocation10 + $0x48] sm:$0xff] %v465_v24  ;;  %v334_v26 = vadd.f32 %v329_v22, %v189_v21  ;;  %v355_v28 = vsub.f32 %v353_v23, %v339_v25 }
  0xc0   :  { %v336_v30 = vsub.f32 %v334_v26, %v320_v29  ;;  %vm357_vm12 = vcmp.gt.f32.partialorder %v355_v28, 0.0  ;;  %v368_v31 = vmul.f32 0.9, %v355_v28 }
  0xc1   :  { %v468_v32 = vsel %vm357_vm12, 1.0, %v576_v13  ;;  %v359_v37 = vsel %vm357_vm12, %v632_v19, 0.0 }
  0xc2   :  { %vm338_vm13 = vcmp.gt.f32.partialorder %v336_v30, 0.0  ;;  %v349_v34 = vmul.f32 0.9, %v336_v30  ;;  %366 = vst [vmem:[#allocation10 + $0x60] sm:$0xff] %v468_v32  ;;  %v373_v35 = vadd.f32 %v368_v31, %v197_v27 }
  0xc3   :  { %v467_v36 = vsel %vm338_vm13, 1.0, %v576_v13  ;;  %v340_v41 = vsel %vm338_vm13, %v632_v19, 0.0 }
  0xc4   :  { %347 = vst [vmem:[#allocation10 + $0x58] sm:$0xff] %v467_v36  ;;  %v375_v38 = vsub.f32 %v373_v35, %v359_v37  ;;  %v354_v39 = vadd.f32 %v349_v34, %v194_v33 }
  0xc6   :  { %vm377_vm14 = vcmp.gt.f32.partialorder %v375_v38, 0.0  ;;  %v356_v42 = vsub.f32 %v354_v39, %v340_v41 }
  0xc7   :  { %v470_v43 = vsel %vm377_vm14, 1.0, %v576_v13 }
  0xc8   :  { %386 = vst [vmem:[#allocation10 + $0x70] sm:$0xff] %v470_v43  ;;  %vm358_vm15 = vcmp.gt.f32.partialorder %v356_v42, 0.0  ;;  %v369_v45 = vmul.f32 0.9, %v356_v42 }
  0xc9   :  { %v469_v46 = vsel %vm358_vm15, 1.0, %v576_v13  ;;  %v360_v48 = vsel %vm358_vm15, %v632_v19, 0.0 }
  0xca   :  { %367 = vst [vmem:[#allocation10 + $0x68] sm:$0xff] %v469_v46  ;;  %v374_v47 = vadd.f32 %v369_v45, %v199_v44 }
  0xcc   :  { %v376_v49 = vsub.f32 %v374_v47, %v360_v48 }
  0xce   :  { %vm378_vm0 = vcmp.gt.f32.partialorder %v376_v49, 0.0 }
  0xcf   :  { %v471_v9 = vsel %vm378_vm0, 1.0, %v576_v13 }
  0xd0   :  { %387 = vst [vmem:[#allocation10 + $0x78] sm:$0xff] %v471_v9 }
  0xd1   :  { %404 = dma.vmem_to_hbm [thread:$0]  %s397_s28, 2048, %s399_s5, [#allocation7], %s578_s6, %s578_s6, %s579_s7  }
  0xd2   :  { %570 = dma.done.wait [#allocation7], 2048  }
  0xd3   :  { %571 = vsyncadd [#allocation7], 4294965248 }
  0xd4   :  { %409 = vsyncpa [#allocation6], 1 }
  0xd5   :  { %410 = vsyncpa [#allocation9], 1 }
  0xd6   :  { %411 = vsyncpa [#allocation7], 1 }

</bundles_post_ra>
